<compile_context>
chip_gen: v6e
topology: v6e:2x2x1
jax: 0.10.0
libtpu: 0.0.40
codegen_flags: <defaults>
</compile_context>

<pallas_src>
from math import comb

import numpy as np
import jax
import jax.numpy as jnp
from jax.experimental import pallas as pl
from jax.experimental.pallas import tpu as pltpu

_LANES = 128


def _make_decorrelation_kernel(lo, inv_width, w_eff, degree, D):
    """Build the kernel with all spline constants baked in.

    lo, inv_width : length-D lists of Python floats (span-adjusted range).
    w_eff         : w_eff[k][pair] = params[k, pair] * C(degree, k)  (floats).
    """
    K = degree + 1

    def kernel(x_ref, out_ref):
        # x_ref / out_ref: (D, TB, 128) float32 blocks in VMEM.
        # Pass-through of every variable first; contributions accumulate below.
        for v in range(D):
            out_ref[v] = x_ref[v]

        for covar in range(D - 1):          # only covar < D-1 feed other vars
            xc = x_ref[covar]                                   # (TB, 128)
            u = (xc - lo[covar]) * inv_width[covar]
            omu = 1.0 - u

            # Running powers u^k, (1-u)^k  (index 0 == 1, handled implicitly).
            u_pows = [None] * K
            omu_pows = [None] * K
            if K > 1:
                au, ao = u, omu
                for k in range(1, K):
                    u_pows[k] = au
                    omu_pows[k] = ao
                    if k + 1 < K:
                        au = au * u
                        ao = ao * omu

            # feats[k] = u^k * (1-u)^(degree-k) * x[covar]   (binomials folded
            # into w_eff host-side).
            feats = []
            for k in range(K):
                terms = []
                if k > 0:
                    terms.append(u_pows[k])
                if degree - k > 0:
                    terms.append(omu_pows[degree - k])
                f = xc
                for t in terms:
                    f = f * t
                feats.append(f)

            # Unrolled VPU multiply-add mixing into every var > covar.
            for var in range(covar + 1, D):
                pair = var * (var - 1) // 2 + covar
                contrib = w_eff[0][pair] * feats[0]
                for k in range(1, K):
                    contrib = contrib + w_eff[k][pair] * feats[k]
                out_ref[var] = out_ref[var] + contrib

    return kernel


def decorrelation_forward(x, params, polynomial_range, degree,
                          span_factor=0.1, block_lane_groups=512):
    """Pallas-backed Decorrelation.forward (inverse=False, returns output only).

    x: (N, D) samples.  params: (degree+1, D*(D-1)//2).  polynomial_range: (2, D).
    """
    N, D = x.shape
    K = degree + 1
    num_lambdas = D * (D - 1) // 2

    # Span-adjusted polynomial range per variable (adjust_ploynomial_range).
    pr = np.asarray(polynomial_range, dtype=np.float64)
    span = pr[1] - pr[0]
    lo_np = pr[0] - span_factor * span
    hi_np = pr[1] + span_factor * span
    inv_width_np = 1.0 / (hi_np - lo_np)
    lo = [float(v) for v in lo_np]
    inv_width = [float(v) for v in inv_width_np]

    # Fold Bernstein binomial coefficients into the per-pair weights.
    p_np = np.asarray(params, dtype=np.float64)
    w_eff = [[float(p_np[k, j]) * comb(degree, k) for j in range(num_lambdas)]
             for k in range(K)]

    # Tile geometry: (D, TB, 128) blocks; TB multiple of 8, ~1 MiB input/step.
    nb_needed = -(-N // _LANES)
    tb = max(8, min(int(block_lane_groups), ((nb_needed + 7) // 8) * 8))
    block_elems = tb * _LANES
    n_pad = -(-N // block_elems) * block_elems
    nb = n_pad // _LANES
    grid = (nb // tb,)

    # (N, D) -> (D, N) -> pad -> (D, nb, 128).  Zero padding is harmless: the
    # padded lanes produce finite values and are sliced away afterwards.
    xt = jnp.transpose(x.astype(jnp.float32))
    xt = jnp.pad(xt, ((0, 0), (0, n_pad - N)))
    x3 = xt.reshape(D, nb, _LANES)

    kernel = _make_decorrelation_kernel(lo, inv_width, w_eff, degree, D)

    out3 = pl.pallas_call(
        kernel,
        out_shape=jax.ShapeDtypeStruct((D, nb, _LANES), jnp.float32),
        grid=grid,
        in_specs=[pl.BlockSpec((D, tb, _LANES), lambda i: (0, i, 0))],
        out_specs=pl.BlockSpec((D, tb, _LANES), lambda i: (0, i, 0)),
        compiler_params=pltpu.CompilerParams(
            dimension_semantics=("parallel",)),
    )(x3)

    out = out3.reshape(D, n_pad)[:, :N].T
    return out.astype(x.dtype)


def reference_forward(x, params, polynomial_range, degree, span_factor=0.1):
    """Plain numpy mirror of the PyTorch double loop (spline = Bernstein basis)."""
    x = np.asarray(x, dtype=np.float64)
    params = np.asarray(params, dtype=np.float64)
    pr = np.asarray(polynomial_range, dtype=np.float64)
    N, D = x.shape
    out = x.copy()
    span = pr[1] - pr[0]
    lo = pr[0] - span_factor * span
    width = (pr[1] + span_factor * span) - lo
    pidx = 0
    for var in range(D):
        for covar in range(var):
            u = (x[:, covar] - lo[covar]) / width[covar]
            lam = np.zeros(N, dtype=np.float64)
            for k in range(degree + 1):
                lam += params[k, pidx] * comb(degree, k) * (u ** k) * ((1.0 - u) ** (degree - k))
            out[:, var] = out[:, var] + lam * x[:, covar]   # uses input column, as in torch code
            pidx += 1
    return out


if __name__ == "__main__":
    key = jax.random.PRNGKey(0)
    k_x, k_p = jax.random.split(key)

    N = 256                      # batch of samples (ragged sizes also handled)
    D = 4                        # number_variables
    degree = 3                   # spline degree -> degree+1 coefficients per pair
    num_lambdas = D * (D - 1) // 2

    x = 2.0 * jax.random.normal(k_x, (N, D), dtype=jnp.float32)
    # Shapes per Decorrelation.__init__ (compute_starting_values_bspline):
    # params has shape (degree + 1, num_lambdas); deterministic synthetic values.
    params = 0.1 * jax.random.normal(k_p, (degree + 1, num_lambdas), dtype=jnp.float32)
    polynomial_range = jnp.array([[-5.0] * D, [5.0] * D], dtype=jnp.float32)  # (2, D)

    out = decorrelation_forward(x, params, polynomial_range, degree)
    out = jax.block_until_ready(out)

    ref = reference_forward(x, params, polynomial_range, degree)
    np.testing.assert_allclose(np.asarray(out, dtype=np.float64), ref,
                               rtol=1e-4, atol=1e-4)
    print("KERNEL_OK")
</pallas_src>

<mosaic_0001>
module attributes {stable_mosaic.version = 11 : i64} {
  func.func @kernel(%arg0: i32, %arg1: memref<4x8x128xf32, #tpu.memory_space<vmem>>, %arg2: memref<4x8x128xf32, #tpu.memory_space<vmem>>) attributes {dimension_semantics = [#tpu.dimension_semantics<parallel>], iteration_bounds = array<i64: 1>, scalar_prefetch = 0 : i64, scratch_operands = 0 : i64, tpu.core_type = #tpu.core_type<tc>, window_params = [{transform_indices = @transform_0, window_bounds = array<i64: 4, 8, 128>}, {transform_indices = @transform_1, window_bounds = array<i64: 4, 8, 128>}]} {
    %c0 = arith.constant 0 : index
    %c0_0 = arith.constant 0 : index
    %c0_1 = arith.constant 0 : index
    %0 = vector.load %arg1[%c0, %c0_0, %c0_1] : memref<4x8x128xf32, #tpu.memory_space<vmem>>, vector<1x8x128xf32>
    %1 = vector.shape_cast %0 : vector<1x8x128xf32> to vector<8x128xf32>
    %c0_2 = arith.constant 0 : index
    %c0_3 = arith.constant 0 : index
    %c0_4 = arith.constant 0 : index
    %2 = vector.load %arg2[%c0_2, %c0_3, %c0_4] : memref<4x8x128xf32, #tpu.memory_space<vmem>>, vector<1x8x128xf32>
    %3 = vector.shape_cast %2 : vector<1x8x128xf32> to vector<8x128xf32>
    %4 = vector.shape_cast %1 : vector<8x128xf32> to vector<1x8x128xf32>
    tpu.vector_store %arg2[%c0_2, %c0_3, %c0_4], %4 {strides = array<i32>} : memref<4x8x128xf32, #tpu.memory_space<vmem>>, vector<1x8x128xf32>,
    %c1 = arith.constant 1 : index
    %c0_5 = arith.constant 0 : index
    %c0_6 = arith.constant 0 : index
    %5 = vector.load %arg1[%c1, %c0_5, %c0_6] : memref<4x8x128xf32, #tpu.memory_space<vmem>>, vector<1x8x128xf32>
    %6 = vector.shape_cast %5 : vector<1x8x128xf32> to vector<8x128xf32>
    %c1_7 = arith.constant 1 : index
    %c0_8 = arith.constant 0 : index
    %c0_9 = arith.constant 0 : index
    %7 = vector.load %arg2[%c1_7, %c0_8, %c0_9] : memref<4x8x128xf32, #tpu.memory_space<vmem>>, vector<1x8x128xf32>
    %8 = vector.shape_cast %7 : vector<1x8x128xf32> to vector<8x128xf32>
    %9 = vector.shape_cast %6 : vector<8x128xf32> to vector<1x8x128xf32>
    tpu.vector_store %arg2[%c1_7, %c0_8, %c0_9], %9 {strides = array<i32>} : memref<4x8x128xf32, #tpu.memory_space<vmem>>, vector<1x8x128xf32>,
    %c2 = arith.constant 2 : index
    %c0_10 = arith.constant 0 : index
    %c0_11 = arith.constant 0 : index
    %10 = vector.load %arg1[%c2, %c0_10, %c0_11] : memref<4x8x128xf32, #tpu.memory_space<vmem>>, vector<1x8x128xf32>
    %11 = vector.shape_cast %10 : vector<1x8x128xf32> to vector<8x128xf32>
    %c2_12 = arith.constant 2 : index
    %c0_13 = arith.constant 0 : index
    %c0_14 = arith.constant 0 : index
    %12 = vector.load %arg2[%c2_12, %c0_13, %c0_14] : memref<4x8x128xf32, #tpu.memory_space<vmem>>, vector<1x8x128xf32>
    %13 = vector.shape_cast %12 : vector<1x8x128xf32> to vector<8x128xf32>
    %14 = vector.shape_cast %11 : vector<8x128xf32> to vector<1x8x128xf32>
    tpu.vector_store %arg2[%c2_12, %c0_13, %c0_14], %14 {strides = array<i32>} : memref<4x8x128xf32, #tpu.memory_space<vmem>>, vector<1x8x128xf32>,
    %c3 = arith.constant 3 : index
    %c0_15 = arith.constant 0 : index
    %c0_16 = arith.constant 0 : index
    %15 = vector.load %arg1[%c3, %c0_15, %c0_16] : memref<4x8x128xf32, #tpu.memory_space<vmem>>, vector<1x8x128xf32>
    %16 = vector.shape_cast %15 : vector<1x8x128xf32> to vector<8x128xf32>
    %c3_17 = arith.constant 3 : index
    %c0_18 = arith.constant 0 : index
    %c0_19 = arith.constant 0 : index
    %17 = vector.load %arg2[%c3_17, %c0_18, %c0_19] : memref<4x8x128xf32, #tpu.memory_space<vmem>>, vector<1x8x128xf32>
    %18 = vector.shape_cast %17 : vector<1x8x128xf32> to vector<8x128xf32>
    %19 = vector.shape_cast %16 : vector<8x128xf32> to vector<1x8x128xf32>
    tpu.vector_store %arg2[%c3_17, %c0_18, %c0_19], %19 {strides = array<i32>} : memref<4x8x128xf32, #tpu.memory_space<vmem>>, vector<1x8x128xf32>,
    %c0_20 = arith.constant 0 : index
    %c0_21 = arith.constant 0 : index
    %c0_22 = arith.constant 0 : index
    %20 = vector.load %arg1[%c0_20, %c0_21, %c0_22] : memref<4x8x128xf32, #tpu.memory_space<vmem>>, vector<1x8x128xf32>
    %21 = vector.shape_cast %20 : vector<1x8x128xf32> to vector<8x128xf32>
    %cst = arith.constant -6.000000e+00 : f32
    %22 = vector.broadcast %cst : f32 to vector<8x128xf32>
    %23 = arith.subf %21, %22 : vector<8x128xf32>
    %cst_23 = arith.constant 0.0833333358 : f32
    %24 = vector.broadcast %cst_23 : f32 to vector<8x128xf32>
    %25 = arith.mulf %23, %24 : vector<8x128xf32>
    %cst_24 = arith.constant 1.000000e+00 : f32
    %26 = vector.broadcast %cst_24 : f32 to vector<8x128xf32>
    %27 = arith.subf %26, %25 : vector<8x128xf32>
    %28 = arith.mulf %25, %25 : vector<8x128xf32>
    %29 = arith.mulf %27, %27 : vector<8x128xf32>
    %30 = arith.mulf %28, %25 : vector<8x128xf32>
    %31 = arith.mulf %29, %27 : vector<8x128xf32>
    %32 = arith.mulf %21, %31 : vector<8x128xf32>
    %33 = arith.mulf %21, %25 : vector<8x128xf32>
    %34 = arith.mulf %33, %29 : vector<8x128xf32>
    %35 = arith.mulf %21, %28 : vector<8x128xf32>
    %36 = arith.mulf %35, %27 : vector<8x128xf32>
    %37 = arith.mulf %21, %30 : vector<8x128xf32>
    %cst_25 = arith.constant -0.244245574 : f32
    %38 = vector.broadcast %cst_25 : f32 to vector<8x128xf32>
    %39 = arith.mulf %38, %32 : vector<8x128xf32>
    %cst_26 = arith.constant -0.344465882 : f32
    %40 = vector.broadcast %cst_26 : f32 to vector<8x128xf32>
    %41 = arith.mulf %40, %34 : vector<8x128xf32>
    %42 = arith.addf %39, %41 : vector<8x128xf32>
    %cst_27 = arith.constant -0.390330017 : f32
    %43 = vector.broadcast %cst_27 : f32 to vector<8x128xf32>
    %44 = arith.mulf %43, %36 : vector<8x128xf32>
    %45 = arith.addf %42, %44 : vector<8x128xf32>
    %cst_28 = arith.constant -0.0956058874 : f32
    %46 = vector.broadcast %cst_28 : f32 to vector<8x128xf32>
    %47 = arith.mulf %46, %37 : vector<8x128xf32>
    %48 = arith.addf %45, %47 : vector<8x128xf32>
    %c1_29 = arith.constant 1 : index
    %c0_30 = arith.constant 0 : index
    %c0_31 = arith.constant 0 : index
    %49 = vector.load %arg2[%c1_29, %c0_30, %c0_31] : memref<4x8x128xf32, #tpu.memory_space<vmem>>, vector<1x8x128xf32>
    %50 = vector.shape_cast %49 : vector<1x8x128xf32> to vector<8x128xf32>
    %51 = arith.addf %50, %48 : vector<8x128xf32>
    %c1_32 = arith.constant 1 : index
    %c0_33 = arith.constant 0 : index
    %c0_34 = arith.constant 0 : index
    %52 = vector.load %arg2[%c1_32, %c0_33, %c0_34] : memref<4x8x128xf32, #tpu.memory_space<vmem>>, vector<1x8x128xf32>
    %53 = vector.shape_cast %52 : vector<1x8x128xf32> to vector<8x128xf32>
    %54 = vector.shape_cast %51 : vector<8x128xf32> to vector<1x8x128xf32>
    tpu.vector_store %arg2[%c1_32, %c0_33, %c0_34], %54 {strides = array<i32>} : memref<4x8x128xf32, #tpu.memory_space<vmem>>, vector<1x8x128xf32>,
    %cst_35 = arith.constant -0.203568056 : f32
    %55 = vector.broadcast %cst_35 : f32 to vector<8x128xf32>
    %56 = arith.mulf %55, %32 : vector<8x128xf32>
    %cst_36 = arith.constant 0.0891497358 : f32
    %57 = vector.broadcast %cst_36 : f32 to vector<8x128xf32>
    %58 = arith.mulf %57, %34 : vector<8x128xf32>
    %59 = arith.addf %56, %58 : vector<8x128xf32>
    %cst_37 = arith.constant -0.224608153 : f32
    %60 = vector.broadcast %cst_37 : f32 to vector<8x128xf32>
    %61 = arith.mulf %60, %36 : vector<8x128xf32>
    %62 = arith.addf %59, %61 : vector<8x128xf32>
    %cst_38 = arith.constant -0.19587639 : f32
    %63 = vector.broadcast %cst_38 : f32 to vector<8x128xf32>
    %64 = arith.mulf %63, %37 : vector<8x128xf32>
    %65 = arith.addf %62, %64 : vector<8x128xf32>
    %c2_39 = arith.constant 2 : index
    %c0_40 = arith.constant 0 : index
    %c0_41 = arith.constant 0 : index
    %66 = vector.load %arg2[%c2_39, %c0_40, %c0_41] : memref<4x8x128xf32, #tpu.memory_space<vmem>>, vector<1x8x128xf32>
    %67 = vector.shape_cast %66 : vector<1x8x128xf32> to vector<8x128xf32>
    %68 = arith.addf %67, %65 : vector<8x128xf32>
    %c2_42 = arith.constant 2 : index
    %c0_43 = arith.constant 0 : index
    %c0_44 = arith.constant 0 : index
    %69 = vector.load %arg2[%c2_42, %c0_43, %c0_44] : memref<4x8x128xf32, #tpu.memory_space<vmem>>, vector<1x8x128xf32>
    %70 = vector.shape_cast %69 : vector<1x8x128xf32> to vector<8x128xf32>
    %71 = vector.shape_cast %68 : vector<8x128xf32> to vector<1x8x128xf32>
    tpu.vector_store %arg2[%c2_42, %c0_43, %c0_44], %71 {strides = array<i32>} : memref<4x8x128xf32, #tpu.memory_space<vmem>>, vector<1x8x128xf32>,
    %cst_45 = arith.constant -0.0353550203 : f32
    %72 = vector.broadcast %cst_45 : f32 to vector<8x128xf32>
    %73 = arith.mulf %72, %32 : vector<8x128xf32>
    %cst_46 = arith.constant 0.639060736 : f32
    %74 = vector.broadcast %cst_46 : f32 to vector<8x128xf32>
    %75 = arith.mulf %74, %34 : vector<8x128xf32>
    %76 = arith.addf %73, %75 : vector<8x128xf32>
    %cst_47 = arith.constant 0.132837206 : f32
    %77 = vector.broadcast %cst_47 : f32 to vector<8x128xf32>
    %78 = arith.mulf %77, %36 : vector<8x128xf32>
    %79 = arith.addf %76, %78 : vector<8x128xf32>
    %cst_48 = arith.constant -0.0322005227 : f32
    %80 = vector.broadcast %cst_48 : f32 to vector<8x128xf32>
    %81 = arith.mulf %80, %37 : vector<8x128xf32>
    %82 = arith.addf %79, %81 : vector<8x128xf32>
    %c3_49 = arith.constant 3 : index
    %c0_50 = arith.constant 0 : index
    %c0_51 = arith.constant 0 : index
    %83 = vector.load %arg2[%c3_49, %c0_50, %c0_51] : memref<4x8x128xf32, #tpu.memory_space<vmem>>, vector<1x8x128xf32>
    %84 = vector.shape_cast %83 : vector<1x8x128xf32> to vector<8x128xf32>
    %85 = arith.addf %84, %82 : vector<8x128xf32>
    %c3_52 = arith.constant 3 : index
    %c0_53 = arith.constant 0 : index
    %c0_54 = arith.constant 0 : index
    %86 = vector.load %arg2[%c3_52, %c0_53, %c0_54] : memref<4x8x128xf32, #tpu.memory_space<vmem>>, vector<1x8x128xf32>
    %87 = vector.shape_cast %86 : vector<1x8x128xf32> to vector<8x128xf32>
    %88 = vector.shape_cast %85 : vector<8x128xf32> to vector<1x8x128xf32>
    tpu.vector_store %arg2[%c3_52, %c0_53, %c0_54], %88 {strides = array<i32>} : memref<4x8x128xf32, #tpu.memory_space<vmem>>, vector<1x8x128xf32>,
    %c1_55 = arith.constant 1 : index
    %c0_56 = arith.constant 0 : index
    %c0_57 = arith.constant 0 : index
    %89 = vector.load %arg1[%c1_55, %c0_56, %c0_57] : memref<4x8x128xf32, #tpu.memory_space<vmem>>, vector<1x8x128xf32>
    %90 = vector.shape_cast %89 : vector<1x8x128xf32> to vector<8x128xf32>
    %cst_58 = arith.constant -6.000000e+00 : f32
    %91 = vector.broadcast %cst_58 : f32 to vector<8x128xf32>
    %92 = arith.subf %90, %91 : vector<8x128xf32>
    %cst_59 = arith.constant 0.0833333358 : f32
    %93 = vector.broadcast %cst_59 : f32 to vector<8x128xf32>
    %94 = arith.mulf %92, %93 : vector<8x128xf32>
    %cst_60 = arith.constant 1.000000e+00 : f32
    %95 = vector.broadcast %cst_60 : f32 to vector<8x128xf32>
    %96 = arith.subf %95, %94 : vector<8x128xf32>
    %97 = arith.mulf %94, %94 : vector<8x128xf32>
    %98 = arith.mulf %96, %96 : vector<8x128xf32>
    %99 = arith.mulf %97, %94 : vector<8x128xf32>
    %100 = arith.mulf %98, %96 : vector<8x128xf32>
    %101 = arith.mulf %90, %100 : vector<8x128xf32>
    %102 = arith.mulf %90, %94 : vector<8x128xf32>
    %103 = arith.mulf %102, %98 : vector<8x128xf32>
    %104 = arith.mulf %90, %97 : vector<8x128xf32>
    %105 = arith.mulf %104, %96 : vector<8x128xf32>
    %106 = arith.mulf %90, %99 : vector<8x128xf32>
    %cst_61 = arith.constant 0.0205544233 : f32
    %107 = vector.broadcast %cst_61 : f32 to vector<8x128xf32>
    %108 = arith.mulf %107, %101 : vector<8x128xf32>
    %cst_62 = arith.constant -0.39316079 : f32
    %109 = vector.broadcast %cst_62 : f32 to vector<8x128xf32>
    %110 = arith.mulf %109, %103 : vector<8x128xf32>
    %111 = arith.addf %108, %110 : vector<8x128xf32>
    %cst_63 = arith.constant -0.11189951 : f32
    %112 = vector.broadcast %cst_63 : f32 to vector<8x128xf32>
    %113 = arith.mulf %112, %105 : vector<8x128xf32>
    %114 = arith.addf %111, %113 : vector<8x128xf32>
    %cst_64 = arith.constant -0.110599421 : f32
    %115 = vector.broadcast %cst_64 : f32 to vector<8x128xf32>
    %116 = arith.mulf %115, %106 : vector<8x128xf32>
    %117 = arith.addf %114, %116 : vector<8x128xf32>
    %c2_65 = arith.constant 2 : index
    %c0_66 = arith.constant 0 : index
    %c0_67 = arith.constant 0 : index
    %118 = vector.load %arg2[%c2_65, %c0_66, %c0_67] : memref<4x8x128xf32, #tpu.memory_space<vmem>>, vector<1x8x128xf32>
    %119 = vector.shape_cast %118 : vector<1x8x128xf32> to vector<8x128xf32>
    %120 = arith.addf %119, %117 : vector<8x128xf32>
    %c2_68 = arith.constant 2 : index
    %c0_69 = arith.constant 0 : index
    %c0_70 = arith.constant 0 : index
    %121 = vector.load %arg2[%c2_68, %c0_69, %c0_70] : memref<4x8x128xf32, #tpu.memory_space<vmem>>, vector<1x8x128xf32>
    %122 = vector.shape_cast %121 : vector<1x8x128xf32> to vector<8x128xf32>
    %123 = vector.shape_cast %120 : vector<8x128xf32> to vector<1x8x128xf32>
    tpu.vector_store %arg2[%c2_68, %c0_69, %c0_70], %123 {strides = array<i32>} : memref<4x8x128xf32, #tpu.memory_space<vmem>>, vector<1x8x128xf32>,
    %cst_71 = arith.constant -0.0761974081 : f32
    %124 = vector.broadcast %cst_71 : f32 to vector<8x128xf32>
    %125 = arith.mulf %124, %101 : vector<8x128xf32>
    %cst_72 = arith.constant -0.0568717048 : f32
    %126 = vector.broadcast %cst_72 : f32 to vector<8x128xf32>
    %127 = arith.mulf %126, %103 : vector<8x128xf32>
    %128 = arith.addf %125, %127 : vector<8x128xf32>
    %cst_73 = arith.constant -0.357089877 : f32
    %129 = vector.broadcast %cst_73 : f32 to vector<8x128xf32>
    %130 = arith.mulf %129, %105 : vector<8x128xf32>
    %131 = arith.addf %128, %130 : vector<8x128xf32>
    %cst_74 = arith.constant 0.133032992 : f32
    %132 = vector.broadcast %cst_74 : f32 to vector<8x128xf32>
    %133 = arith.mulf %132, %106 : vector<8x128xf32>
    %134 = arith.addf %131, %133 : vector<8x128xf32>
    %c3_75 = arith.constant 3 : index
    %c0_76 = arith.constant 0 : index
    %c0_77 = arith.constant 0 : index
    %135 = vector.load %arg2[%c3_75, %c0_76, %c0_77] : memref<4x8x128xf32, #tpu.memory_space<vmem>>, vector<1x8x128xf32>
    %136 = vector.shape_cast %135 : vector<1x8x128xf32> to vector<8x128xf32>
    %137 = arith.addf %136, %134 : vector<8x128xf32>
    %c3_78 = arith.constant 3 : index
    %c0_79 = arith.constant 0 : index
    %c0_80 = arith.constant 0 : index
    %138 = vector.load %arg2[%c3_78, %c0_79, %c0_80] : memref<4x8x128xf32, #tpu.memory_space<vmem>>, vector<1x8x128xf32>
    %139 = vector.shape_cast %138 : vector<1x8x128xf32> to vector<8x128xf32>
    %140 = vector.shape_cast %137 : vector<8x128xf32> to vector<1x8x128xf32>
    tpu.vector_store %arg2[%c3_78, %c0_79, %c0_80], %140 {strides = array<i32>} : memref<4x8x128xf32, #tpu.memory_space<vmem>>, vector<1x8x128xf32>,
    %c2_81 = arith.constant 2 : index
    %c0_82 = arith.constant 0 : index
    %c0_83 = arith.constant 0 : index
    %141 = vector.load %arg1[%c2_81, %c0_82, %c0_83] : memref<4x8x128xf32, #tpu.memory_space<vmem>>, vector<1x8x128xf32>
    %142 = vector.shape_cast %141 : vector<1x8x128xf32> to vector<8x128xf32>
    %cst_84 = arith.constant -6.000000e+00 : f32
    %143 = vector.broadcast %cst_84 : f32 to vector<8x128xf32>
    %144 = arith.subf %142, %143 : vector<8x128xf32>
    %cst_85 = arith.constant 0.0833333358 : f32
    %145 = vector.broadcast %cst_85 : f32 to vector<8x128xf32>
    %146 = arith.mulf %144, %145 : vector<8x128xf32>
    %cst_86 = arith.constant 1.000000e+00 : f32
    %147 = vector.broadcast %cst_86 : f32 to vector<8x128xf32>
    %148 = arith.subf %147, %146 : vector<8x128xf32>
    %149 = arith.mulf %146, %146 : vector<8x128xf32>
    %150 = arith.mulf %148, %148 : vector<8x128xf32>
    %151 = arith.mulf %149, %146 : vector<8x128xf32>
    %152 = arith.mulf %150, %148 : vector<8x128xf32>
    %153 = arith.mulf %142, %152 : vector<8x128xf32>
    %154 = arith.mulf %142, %146 : vector<8x128xf32>
    %155 = arith.mulf %154, %150 : vector<8x128xf32>
    %156 = arith.mulf %142, %149 : vector<8x128xf32>
    %157 = arith.mulf %156, %148 : vector<8x128xf32>
    %158 = arith.mulf %142, %151 : vector<8x128xf32>
    %cst_87 = arith.constant -0.117855184 : f32
    %159 = vector.broadcast %cst_87 : f32 to vector<8x128xf32>
    %160 = arith.mulf %159, %153 : vector<8x128xf32>
    %cst_88 = arith.constant 0.289203644 : f32
    %161 = vector.broadcast %cst_88 : f32 to vector<8x128xf32>
    %162 = arith.mulf %161, %155 : vector<8x128xf32>
    %163 = arith.addf %160, %162 : vector<8x128xf32>
    %cst_89 = arith.constant -0.0207766909 : f32
    %164 = vector.broadcast %cst_89 : f32 to vector<8x128xf32>
    %165 = arith.mulf %164, %157 : vector<8x128xf32>
    %166 = arith.addf %163, %165 : vector<8x128xf32>
    %cst_90 = arith.constant 0.081223689 : f32
    %167 = vector.broadcast %cst_90 : f32 to vector<8x128xf32>
    %168 = arith.mulf %167, %158 : vector<8x128xf32>
    %169 = arith.addf %166, %168 : vector<8x128xf32>
    %c3_91 = arith.constant 3 : index
    %c0_92 = arith.constant 0 : index
    %c0_93 = arith.constant 0 : index
    %170 = vector.load %arg2[%c3_91, %c0_92, %c0_93] : memref<4x8x128xf32, #tpu.memory_space<vmem>>, vector<1x8x128xf32>
    %171 = vector.shape_cast %170 : vector<1x8x128xf32> to vector<8x128xf32>
    %172 = arith.addf %171, %169 : vector<8x128xf32>
    %c3_94 = arith.constant 3 : index
    %c0_95 = arith.constant 0 : index
    %c0_96 = arith.constant 0 : index
    %173 = vector.load %arg2[%c3_94, %c0_95, %c0_96] : memref<4x8x128xf32, #tpu.memory_space<vmem>>, vector<1x8x128xf32>
    %174 = vector.shape_cast %173 : vector<1x8x128xf32> to vector<8x128xf32>
    %175 = vector.shape_cast %172 : vector<8x128xf32> to vector<1x8x128xf32>
    tpu.vector_store %arg2[%c3_94, %c0_95, %c0_96], %175 {strides = array<i32>} : memref<4x8x128xf32, #tpu.memory_space<vmem>>, vector<1x8x128xf32>,
    return
  }
  func.func @transform_0(%arg0: i32) -> (i32, i32, i32) {
    %c0_i32 = arith.constant 0 : i32
    %c0_i32_0 = arith.constant 0 : i32
    %c0_i32_1 = arith.constant 0 : i32
    return %c0_i32, %arg0, %c0_i32_0 : i32, i32, i32
  }
  func.func @transform_1(%arg0: i32) -> (i32, i32, i32) {
    %c0_i32 = arith.constant 0 : i32
    %c0_i32_0 = arith.constant 0 : i32
    %c0_i32_1 = arith.constant 0 : i32
    return %c0_i32, %arg0, %c0_i32_0 : i32, i32, i32
  }
}

</mosaic_0001>

<bundles_post_ra>
// kernel: tpu_custom_call.1
= control target key start
LH: loop header
LB: loop body
LE: loop exit
PB: predicated region body
PF: predicated region fallthrough
CT: control target
= control target key end

     0   :  { %6 = vsyncpa [#allocation3], 0  ;;  %s255_s0 = inlined_call_operand.hbm [shape: f32[4,8,128], index: 0, kind: input, shape index: {}]   ;;  %s256_s1 = inlined_call_operand.hbm [shape: f32[4,8,128], index: 1, kind: output, shape index: {}]  }
   0x1   :  { %7 = vsyncpa [#allocation4], 0  ;;  %s207_s6 = smov [#allocation2]  }
   0x2   :  { %s13_s7 = sshll.u32 %s207_s6, 4  ;;  %s14_s7 = int_to_ptr.vmem [resolvable:$true] %s13_s7 }
   0x3   :  { %s171_s8 = scalar_lea.vmem %s14_s7, 512  ;;  %p176_p1 = scmp.lt.s32.totalorder %s14_s7, %s14_s7 }
   0x4   :  { %p172_p0 = scmp.ne.s32.totalorder %s14_s7, %s171_s8  ;;  %p177_p2 = scmp.lt.s32.totalorder %s171_s8, %s171_s8 }
   0x6   :  { %p178_p3 = por %p177_p2, %p176_p1 }
   0x8   :  { %p179_p4 = pnand %p178_p3, %p172_p0 }
   0xa   :  { %182 = shalt.err (!%p179_p4)
}
   0xb   :  { %s208_s9 = smov 128   ;;  %s209_s10 = smov 8  }
   0xc   :  { %19 = dma.hbm_to_vmem [thread:$0]  %s255_s0, 512, %s14_s7, [#allocation3], %s208_s9, %s208_s9, %s209_s10  }
   0xd   :  { %203 = dma.done.wait [#allocation3], 512  }
   0xe   :  { %204 = vsyncadd [#allocation3], 4294966784  ;;  %v227_v0 = vld [vmem:[#allocation2 + $0x10] sm:$0xff]  ;;  %v37_v1 = vld [vmem:[#allocation2] sm:$0xff]  ;;  %s210_s0 = smov [#allocation5]  }
   0xf   :  { %v156_v2 = vadd.f32 6.0, %v37_v1  ;;  %v229_v3 = vld [vmem:[#allocation2 + $0x8] sm:$0xff]  ;;  %24 = vst [vmem:[#allocation5] sm:$0xff] %v37_v1  ;;  %v158_v4 = vadd.f32 6.0, %v227_v0  ;;  %s144_s13 = sshll.u32 %s210_s0, 4  ;;  %s145_s13 = int_to_ptr.vmem [resolvable:$true] %s144_s13 }
  0x10   :  { %v157_v5 = vadd.f32 6.0, %v229_v3  ;;  %s183_s14 = scalar_lea.vmem %s145_s13, 512  ;;  %p188_p6 = scmp.lt.s32.totalorder %s145_s13, %s145_s13 }
  0x11   :  { %v39_v6 = vmul.f32 0.083333336, %v156_v2  ;;  %v117_v7 = vmul.f32 0.083333336, %v158_v4  ;;  %v34_v2 = vld [vmem:[#allocation2 + $0x18] sm:$0xff]  ;;  %p184_p5 = scmp.ne.s32.totalorder %s145_s13, %s183_s14  ;;  %p189_p7 = scmp.lt.s32.totalorder %s183_s14, %s183_s14 }
  0x12   :  { %v83_v8 = vmul.f32 0.083333336, %v157_v5 }
  0x13   :  { %v40_v9 = vsub.f32 1.0, %v39_v6  ;;  %v41_v10 = vmul.f32 %v39_v6, %v39_v6  ;;  %v46_v11 = vmul.f32 %v39_v6, %v37_v1  ;;  %v233_v12 = vsub.f32 1.0, %v117_v7  ;;  %p190_p8 = por %p189_p7, %p188_p6 }
  0x14   :  { %v84_v13 = vsub.f32 1.0, %v83_v8  ;;  %v85_v14 = vmul.f32 %v83_v8, %v83_v8  ;;  %v90_v15 = vmul.f32 %v83_v8, %v229_v3  ;;  %v119_v16 = vmul.f32 %v117_v7, %v117_v7 }
  0x15   :  { %v42_v17 = vmul.f32 %v40_v9, %v40_v9  ;;  %v43_v18 = vmul.f32 %v41_v10, %v39_v6  ;;  %v48_v19 = vmul.f32 %v41_v10, %v37_v1  ;;  %v120_v20 = vmul.f32 %v233_v12, %v233_v12  ;;  %p191_p9 = pnand %p190_p8, %p184_p5 }
  0x16   :  { %v86_v21 = vmul.f32 %v84_v13, %v84_v13  ;;  %v87_v22 = vmul.f32 %v85_v14, %v83_v8  ;;  %v92_v23 = vmul.f32 %v85_v14, %v229_v3  ;;  %v121_v24 = vmul.f32 %v119_v16, %v117_v7 }
  0x17   :  { %v44_v25 = vmul.f32 %v42_v17, %v40_v9  ;;  %v47_v26 = vmul.f32 %v46_v11, %v42_v17  ;;  %v49_v27 = vmul.f32 %v48_v19, %v40_v9  ;;  %v50_v28 = vmul.f32 %v43_v18, %v37_v1 }
  0x18   :  { %v88_v29 = vmul.f32 %v86_v21, %v84_v13  ;;  %v91_v30 = vmul.f32 %v90_v15, %v86_v21  ;;  %v93_v31 = vmul.f32 %v92_v23, %v84_v13  ;;  %v94_v32 = vmul.f32 %v87_v22, %v229_v3 }
  0x19   :  { %v45_v33 = vmul.f32 %v44_v25, %v37_v1  ;;  %v72_v34 = vmul.f32 0.63906074, %v47_v26  ;;  %v74_v35 = vmul.f32 0.1328372, %v49_v27  ;;  %v76_v36 = vmul.f32 -0.032200523, %v50_v28 }
  0x1a   :  { %v62_v37 = vmul.f32 0.089149736, %v47_v26  ;;  %v64_v38 = vmul.f32 -0.22460815, %v49_v27  ;;  %v66_v39 = vmul.f32 -0.19587639, %v50_v28  ;;  %v89_v40 = vmul.f32 %v88_v29, %v229_v3 }
  0x1b   :  { %v71_v41 = vmul.f32 -0.03535502, %v45_v33  ;;  %v61_v42 = vmul.f32 -0.20356806, %v45_v33  ;;  %v106_v43 = vmul.f32 -0.056871705, %v91_v30  ;;  %v122_v44 = vmul.f32 %v120_v20, %v233_v12 }
  0x1c   :  { %v105_v45 = vmul.f32 -0.07619741, %v89_v40  ;;  %v108_v46 = vmul.f32 -0.35708988, %v93_v31  ;;  %v110_v47 = vmul.f32 0.13303299, %v94_v32  ;;  %v124_v48 = vmul.f32 %v117_v7, %v227_v0 }
  0x1d   :  { %v73_v49 = vadd.f32 %v72_v34, %v71_v41  ;;  %v63_v50 = vadd.f32 %v62_v37, %v61_v42  ;;  %v51_v51 = vmul.f32 -0.24424557, %v45_v33  ;;  %v52_v52 = vmul.f32 -0.34446588, %v47_v26 }
  0x1e   :  { %v107_v53 = vadd.f32 %v106_v43, %v105_v45  ;;  %v54_v54 = vmul.f32 -0.39033002, %v49_v27  ;;  %v56_v55 = vmul.f32 -0.09560589, %v50_v28  ;;  %v95_v56 = vmul.f32 0.020554423, %v89_v40 }
  0x1f   :  { %v75_v57 = vadd.f32 %v74_v35, %v73_v49  ;;  %v65_v58 = vadd.f32 %v64_v38, %v63_v50  ;;  %v53_v59 = vadd.f32 %v52_v52, %v51_v51  ;;  %v96_v60 = vmul.f32 -0.3931608, %v91_v30 }
  0x20   :  { %v109_v61 = vadd.f32 %v108_v46, %v107_v53  ;;  %v98_v62 = vmul.f32 -0.11189951, %v93_v31  ;;  %v100_v63 = vmul.f32 -0.11059942, %v94_v32  ;;  %v123_v1 = vmul.f32 %v122_v44, %v227_v0 }
  0x21   :  { %v77_v4 = vadd.f32 %v76_v36, %v75_v57  ;;  %v67_v5 = vadd.f32 %v66_v39, %v65_v58  ;;  %v55_v6 = vadd.f32 %v54_v54, %v53_v59  ;;  %v97_v7 = vadd.f32 %v96_v60, %v95_v56 }
  0x22   :  { %v125_v8 = vmul.f32 %v124_v48, %v120_v20  ;;  %v126_v9 = vmul.f32 %v119_v16, %v227_v0  ;;  %v128_v10 = vmul.f32 %v121_v24, %v227_v0  ;;  %v111_v13 = vadd.f32 %v110_v47, %v109_v61 }
  0x23   :  { %v69_v11 = vadd.f32 %v67_v5, %v227_v0  ;;  %v57_v14 = vadd.f32 %v56_v55, %v55_v6  ;;  %v99_v15 = vadd.f32 %v98_v62, %v97_v7  ;;  %v79_v17 = vadd.f32 %v77_v4, %v34_v2 }
  0x24   :  { %v127_v18 = vmul.f32 %v126_v9, %v233_v12  ;;  %v129_v19 = vmul.f32 -0.117855184, %v123_v1  ;;  %v130_v21 = vmul.f32 0.28920364, %v125_v8  ;;  %v134_v20 = vmul.f32 0.08122369, %v128_v10 }
  0x25   :  { %v59_v22 = vadd.f32 %v57_v14, %v229_v3  ;;  %v101_v23 = vadd.f32 %v100_v63, %v99_v15  ;;  %v113_v27 = vadd.f32 %v111_v13, %v79_v17 }
  0x26   :  { %v131_v25 = vadd.f32 %v130_v21, %v129_v19  ;;  %v132_v26 = vmul.f32 -0.02077669, %v127_v18 }
  0x27   :  { %60 = vst [vmem:[#allocation5 + $0x8] sm:$0xff] %v59_v22  ;;  %v103_v16 = vadd.f32 %v101_v23, %v69_v11 }
  0x28   :  { %v133_v24 = vadd.f32 %v132_v26, %v131_v25 }
  0x29   :  { %104 = vst [vmem:[#allocation5 + $0x10] sm:$0xff] %v103_v16 }
  0x2a   :  { %v135_v0 = vadd.f32 %v134_v20, %v133_v24 }
  0x2c   :  { %v137_v28 = vadd.f32 %v135_v0, %v113_v27 }
  0x2e   :  { %138 = vst [vmem:[#allocation5 + $0x18] sm:$0xff] %v137_v28 }
  0x2f   :  { %194 = shalt.err (!%p191_p9)
}
  0x30   :  { %150 = dma.vmem_to_hbm [thread:$0]  %s145_s13, 512, %s256_s1, [#allocation4], %s208_s9, %s208_s9, %s209_s10  }
  0x31   :  { %205 = dma.done.wait [#allocation4], 512  }
  0x32   :  { %206 = vsyncadd [#allocation4], 4294966784 }
  0x33   :  { %154 = vsyncpa [#allocation3], 1 }
  0x34   :  { %155 = vsyncpa [#allocation4], 1 }

</bundles_post_ra>
